<compile_context>
chip_gen: v6e
topology: v6e:2x2x1
jax: 0.10.0
libtpu: 0.0.40
codegen_flags: <defaults>
</compile_context>

<pallas_src>
import math

import jax
import jax.numpy as jnp
from jax import lax
from jax.experimental import pallas as pl
from jax.experimental.pallas import tpu as pltpu


def _to_2tuple(v):
    return (v, v) if isinstance(v, int) else tuple(v)


def _round_up(x, m):
    return ((x + m - 1) // m) * m


# ~0.35us per grid step, expressed in "row equivalents" for the tile search.
_GRID_STEP_OVERHEAD_ROWS = 256


def _choose_tile_m(M, tile_m_max=1024):
    """Row-tile size: multiple of 16 (bf16 packs 16 rows/vreg), <= tile_m_max,
    minimizing (padded rows + per-grid-step overhead); prefers >= 2 tiles so
    both v7x TensorCores get work when the row count permits."""
    tile_m_max = max(16, (int(tile_m_max) // 16) * 16)
    M16 = _round_up(max(int(M), 1), 16)
    if M16 <= min(tile_m_max, 256):
        return M16  # tiny problem: single tile; splitting only adds overhead
    best_tm, best_cost = 16, None
    for tm in range(16, min(tile_m_max, M16) + 1, 16):
        m_pad = _round_up(M16, tm)
        grid_m = m_pad // tm
        cost = m_pad + grid_m * _GRID_STEP_OVERHEAD_ROWS
        if grid_m < 2:
            cost += _GRID_STEP_OVERHEAD_ROWS  # soft preference: >= 2 tiles
        if best_cost is None or cost < best_cost or (cost == best_cost and tm > best_tm):
            best_tm, best_cost = tm, cost
    return best_tm


def _choose_tile_n(N_pad, grid_m):
    """Keep the weight fully VMEM-resident when the row grid already has >= 2
    parallel tiles; otherwise split N so a v7x chip can use both cores."""
    if grid_m >= 2 or N_pad <= 128:
        return N_pad
    for cand in range(N_pad // 2, 127, -128):
        if N_pad % cand == 0:
            return cand
    return 128


def _vmem_capacity_bytes():
    try:
        cap = getattr(pltpu.get_tpu_info(), "vmem_capacity_bytes", None)
        if cap:
            return int(cap)
    except Exception:
        pass
    return 64 * 1024 * 1024  # conservative fallback (v7x per-TC physical)


# ----------------------------- Pallas kernel ------------------------------ #
def _proj_kernel(x_ref, w_ref, b_ref, o_ref):
    # x_ref: (TM, K) patch tile (streamed); w_ref: (K, TN) weight slice
    # (VMEM-resident); b_ref: (1, TN) f32 bias; o_ref: (TM, TN) output tile.
    # Body kept minimal (matmul + bias + cast): on v5e the MXU slot is the
    # bottleneck and the VPU work here is free filler.
    acc = jnp.dot(x_ref[...], w_ref[...], preferred_element_type=jnp.float32)
    o_ref[...] = (acc + b_ref[...]).astype(o_ref.dtype)


def _proj_pallas(patches, w, b, out_dtype, tm, tn):
    """patches: (M, K), w: (K, N), b: (1, N) f32 -> (M, N) out_dtype.

    Caller guarantees: M % tm == 0, tm % 16 == 0, K % 128 == 0,
    N % tn == 0, tn % 128 == 0.
    """
    M, K = patches.shape
    _, N = w.shape
    grid_m = M // tm
    grid_n = N // tn

    in_bytes = patches.dtype.itemsize
    out_bytes = jnp.dtype(out_dtype).itemsize
    # Double-buffered patch + out tiles; weight/bias counted twice because
    # Pallas may still double-buffer constant-index blocks.
    vmem_need = (2 * tm * K * in_bytes
                 + 2 * K * tn * in_bytes
                 + 2 * tn * 4
                 + 2 * tm * tn * out_bytes)
    vmem_limit = max(32 * 1024 * 1024, vmem_need + (4 << 20))
    vmem_limit = min(vmem_limit, int(_vmem_capacity_bytes() * 0.85))

    weight_reads = K * N * in_bytes * (grid_m if grid_n > 1 else 1)
    cost = pl.CostEstimate(
        flops=2 * M * K * N,
        transcendentals=0,
        bytes_accessed=(M * K * in_bytes + weight_reads
                        + M * N * out_bytes + N * 4),
    )

    return pl.pallas_call(
        _proj_kernel,
        out_shape=jax.ShapeDtypeStruct((M, N), out_dtype),
        grid=(grid_m, grid_n),
        in_specs=[
            pl.BlockSpec((tm, K), lambda i, j: (i, 0)),   # patch tile, streamed
            pl.BlockSpec((K, tn), lambda i, j: (0, j)),   # weight slice
            pl.BlockSpec((1, tn), lambda i, j: (0, j)),   # bias slice
        ],
        out_specs=pl.BlockSpec((tm, tn), lambda i, j: (i, j)),
        compiler_params=pltpu.CompilerParams(
            dimension_semantics=("parallel", "parallel"),
            vmem_limit_bytes=vmem_limit,
        ),
        cost_estimate=cost,
    )(patches, w, b)


# --------------------------- Module equivalent ----------------------------- #
class PatchEmbedOverlapPallas:
    def __init__(self, img_size=224, patch_size=16, stride_size=20,
                 in_chans=3, embed_dim=768, key=None,
                 compute_dtype=jnp.bfloat16, tile_m=1024):
        img_size = _to_2tuple(img_size)
        patch_size = _to_2tuple(patch_size)
        stride_size = _to_2tuple(stride_size)
        self.img_size = img_size
        self.patch_size = patch_size
        self.stride_size = stride_size
        self.in_chans = in_chans
        self.embed_dim = embed_dim
        self.compute_dtype = compute_dtype
        self.tile_m = tile_m
        self.num_x = (img_size[1] - patch_size[1]) // stride_size[1] + 1
        self.num_y = (img_size[0] - patch_size[0]) // stride_size[0] + 1
        self.num_patches = self.num_x * self.num_y

        if key is None:
            key = jax.random.PRNGKey(0)
        kw, kb = jax.random.split(key)
        # Matches the PyTorch init: weight ~ N(0, sqrt(2/n)), n = kh*kw*out_ch
        n = patch_size[0] * patch_size[1] * embed_dim
        std = math.sqrt(2.0 / n)
        # weight kept in PyTorch conv layout: (embed_dim, C, ph, pw)
        self.weight = std * jax.random.normal(
            kw, (embed_dim, in_chans, patch_size[0], patch_size[1]),
            dtype=jnp.float32)
        # Conv2d default bias init: U(-1/sqrt(fan_in), 1/sqrt(fan_in))
        fan_in = in_chans * patch_size[0] * patch_size[1]
        bound = 1.0 / math.sqrt(fan_in)
        self.bias = jax.random.uniform(
            kb, (embed_dim,), minval=-bound, maxval=bound, dtype=jnp.float32)

        # Precompute the Pallas-side weight/bias once (cast + transpose + pad),
        # so the forward graph is just extract + pallas_call.
        K = in_chans * patch_size[0] * patch_size[1]
        self.K = K
        self.K_pad = _round_up(K, 128)
        self.N_pad = _round_up(embed_dim, 128)
        # (E, C, ph, pw) -> (E, K) -> (K, E): per-patch feature order (C,ph,pw)
        w = self.weight.reshape(embed_dim, K).T.astype(compute_dtype)
        self.w_pad = jnp.pad(
            w, ((0, self.K_pad - K), (0, self.N_pad - embed_dim)))
        b = self.bias.reshape(1, embed_dim).astype(jnp.float32)
        self.b_pad = jnp.pad(b, ((0, 0), (0, self.N_pad - embed_dim)))

    def __call__(self, x, out_dtype=None):
        # x: (B, C, H, W) — NCHW, same as the PyTorch module.
        B, C, H, W = x.shape
        assert H == self.img_size[0] and W == self.img_size[1], (
            f"Input image size ({H}*{W}) doesn't match model "
            f"({self.img_size[0]}*{self.img_size[1]}).")
        ph, pw = self.patch_size
        sh, sw = self.stride_size
        out_dtype = self.compute_dtype if out_dtype is None else out_dtype

        # Cast BEFORE extraction: the whole prologue moves bf16, not f32.
        x = x.astype(self.compute_dtype)

        # Overlapping patch extraction with XLA's native strided-window
        # extractor (no integer-array gather).  Feature order is (C, ph, pw),
        # matching the weight reshape; the NHWC out_spec writes channel-last,
        # so the (M, K) im2col view below is a free reshape (no transpose pass).
        patches = lax.conv_general_dilated_patches(
            x, filter_shape=(ph, pw), window_strides=(sh, sw),
            padding="VALID", dimension_numbers=("NCHW", "OIHW", "NHWC"))
        # patches: (B, num_y, num_x, K)

        P = self.num_patches
        K = self.K
        N = self.embed_dim
        M = B * P
        patches = patches.reshape(M, K)

        # Tiling / alignment.
        tm = _choose_tile_m(M, self.tile_m)
        M_pad = _round_up(M, tm)
        grid_m = M_pad // tm
        tn = _choose_tile_n(self.N_pad, grid_m)

        pad_m = M_pad - M
        pad_k = self.K_pad - K
        if pad_m or pad_k:
            patches = jnp.pad(patches, ((0, pad_m), (0, pad_k)))

        out = _proj_pallas(patches, self.w_pad, self.b_pad, out_dtype, tm, tn)
        out = out[:M, :N]
        return out.reshape(B, P, N)


# ---------------------------------- main ----------------------------------- #
if __name__ == "__main__":
    # Small shapes consistent with the module:
    #   img 16x16, patch 8x8, stride 4 -> num_y = num_x = 3 -> 9 patches
    B, C, H, W = 2, 4, 16, 16
    embed_dim = 32

    key = jax.random.PRNGKey(0)
    kx, kp = jax.random.split(key)
    x = jax.random.normal(kx, (B, C, H, W), dtype=jnp.float32)

    mod = PatchEmbedOverlapPallas(img_size=16, patch_size=8, stride_size=4,
                                  in_chans=C, embed_dim=embed_dim, key=kp)

    out = jax.jit(mod.__call__)(x)
    out = jax.block_until_ready(out)
    assert out.shape == (B, mod.num_patches, embed_dim), out.shape
    assert out.dtype == jnp.dtype(mod.compute_dtype), out.dtype

    # Reference: same conv semantics (nn.Conv2d), with inputs rounded to the
    # kernel's bf16 compute dtype so the comparison is precision-matched
    # (bf16*bf16 products are exact in f32; both sides accumulate in f32;
    # tolerance covers the final bf16 rounding of the kernel output).
    x_q = x.astype(jnp.bfloat16).astype(jnp.float32)
    w_q = mod.weight.astype(jnp.bfloat16).astype(jnp.float32)
    ref = lax.conv_general_dilated(
        x_q, w_q, window_strides=mod.stride_size, padding="VALID",
        dimension_numbers=("NCHW", "OIHW", "NCHW"),
        precision=lax.Precision.HIGHEST)
    ref = ref + mod.bias[None, :, None, None]
    ref = ref.reshape(B, embed_dim, -1).transpose(0, 2, 1)

    out_f32 = out.astype(jnp.float32)
    max_err = float(jnp.max(jnp.abs(out_f32 - ref)))
    assert jnp.allclose(out_f32, ref, atol=3e-2, rtol=3e-2), max_err

    print("KERNEL_OK")
</pallas_src>

<mosaic_0001>
module attributes {stable_mosaic.version = 11 : i64} {
  func.func @_proj_kernel(%arg0: i32, %arg1: i32, %arg2: memref<32x256xbf16, #tpu.memory_space<vmem>>, %arg3: memref<256x128xbf16, #tpu.memory_space<vmem>>, %arg4: memref<1x128xf32, #tpu.memory_space<vmem>>, %arg5: memref<32x128xbf16, #tpu.memory_space<vmem>>) attributes {dimension_semantics = [#tpu.dimension_semantics<parallel>, #tpu.dimension_semantics<parallel>], iteration_bounds = array<i64: 1, 1>, scalar_prefetch = 0 : i64, scratch_operands = 0 : i64, tpu.core_type = #tpu.core_type<tc>, window_params = [{transform_indices = @transform_0, window_bounds = array<i64: 32, 256>}, {transform_indices = @transform_1, window_bounds = array<i64: 256, 128>}, {transform_indices = @transform_2, window_bounds = array<i64: 1, 128>}, {transform_indices = @transform_3, window_bounds = array<i64: 32, 128>}]} {
    %c0 = arith.constant 0 : index
    %c0_0 = arith.constant 0 : index
    %0 = vector.load %arg2[%c0, %c0_0] : memref<32x256xbf16, #tpu.memory_space<vmem>>, vector<32x256xbf16>
    %c0_1 = arith.constant 0 : index
    %c0_2 = arith.constant 0 : index
    %1 = vector.load %arg3[%c0_1, %c0_2] : memref<256x128xbf16, #tpu.memory_space<vmem>>, vector<256x128xbf16>
    %cst = arith.constant dense<0.000000e+00> : vector<32x128xf32>
    %2 = tpu.matmul %0, %1, %cst {dimension_numbers = #tpu.dot_dimension_numbers<[1], [0], [0], [1], [0, 0, 1, 1], [], []>} : vector<32x256xbf16>, vector<256x128xbf16>, vector<32x128xf32> -> vector<32x128xf32>
    %c0_3 = arith.constant 0 : index
    %c0_4 = arith.constant 0 : index
    %3 = vector.load %arg4[%c0_3, %c0_4] : memref<1x128xf32, #tpu.memory_space<vmem>>, vector<1x128xf32>
    %4 = vector.broadcast %3 : vector<1x128xf32> to vector<32x128xf32>
    %5 = arith.addf %2, %4 : vector<32x128xf32>
    %6 = arith.truncf %5 : vector<32x128xf32> to vector<32x128xbf16>
    %c0_5 = arith.constant 0 : index
    %c0_6 = arith.constant 0 : index
    %7 = vector.load %arg5[%c0_5, %c0_6] : memref<32x128xbf16, #tpu.memory_space<vmem>>, vector<32x128xbf16>
    tpu.vector_store %arg5[%c0_5, %c0_6], %6 {strides = array<i32>} : memref<32x128xbf16, #tpu.memory_space<vmem>>, vector<32x128xbf16>,
    return
  }
  func.func @transform_0(%arg0: i32, %arg1: i32) -> (i32, i32) {
    %c0_i32 = arith.constant 0 : i32
    %c0_i32_0 = arith.constant 0 : i32
    return %arg0, %c0_i32 : i32, i32
  }
  func.func @transform_1(%arg0: i32, %arg1: i32) -> (i32, i32) {
    %c0_i32 = arith.constant 0 : i32
    %c0_i32_0 = arith.constant 0 : i32
    return %c0_i32, %arg1 : i32, i32
  }
  func.func @transform_2(%arg0: i32, %arg1: i32) -> (i32, i32) {
    %c0_i32 = arith.constant 0 : i32
    %c0_i32_0 = arith.constant 0 : i32
    return %c0_i32, %arg1 : i32, i32
  }
  func.func @transform_3(%arg0: i32, %arg1: i32) -> (i32, i32) {
    %c0_i32 = arith.constant 0 : i32
    return %arg0, %arg1 : i32, i32
  }
}

</mosaic_0001>

<bundles_post_ra>
// kernel: a_call__.1
= control target key start
LH: loop header
LB: loop body
LE: loop exit
PB: predicated region body
PF: predicated region fallthrough
CT: control target
= control target key end

     0   :  { %s442_s1 = inlined_call_operand.vmem [shape: bf16[256,128], index: 1, kind: input, shape index: {}]   ;;  %s443_s0 = inlined_call_operand.vmem [shape: bf16[32,256], index: 0, kind: input, shape index: {}]   ;;  %s444_s2 = inlined_call_operand.vmem [shape: f32[1,128], index: 2, kind: input, shape index: {}]   ;;  %s445_s3 = inlined_call_operand.vmem [shape: bf16[32,128], index: 3, kind: output, shape index: {}]  }
   0x1   :  { %v331_v0 = vld [vmem:[%s442_s1 + $0x78] sm:$0xff]   ;;  %v333_v2 = vld [vmem:[%s442_s1 + $0x70] sm:$0xff]   ;;  %v335_v4 = vld [vmem:[%s442_s1 + $0x68] sm:$0xff]  }
   0x2   :  { %v332_v1 = vld [vmem:[%s442_s1 + $0x38] sm:$0xff]   ;;  %287 = vmatprep.subr.bf16.mxu0 %v331_v0  ;;  %315 = vmatprep.subr.bf16.mxu1 %v331_v0  ;;  %v334_v3 = vld [vmem:[%s442_s1 + $0x30] sm:$0xff]   ;;  %v336_v5 = vld [vmem:[%s442_s1 + $0x28] sm:$0xff]  }
   0x3   :  { %288 = vmatpush3.bf16.msra.mxu0 %v332_v1  ;;  %323 = vmatpush3.bf16.msra.mxu1 %v332_v1  ;;  %v337_v6 = vld [vmem:[%s442_s1 + $0x60] sm:$0xff]   ;;  %v339_v8 = vld [vmem:[%s442_s1 + $0x58] sm:$0xff]   ;;  %v341_v10 = vld [vmem:[%s442_s1 + $0x50] sm:$0xff]  }
   0x4   :  { %289 = vmatprep.subr.bf16.mxu0 %v333_v2  ;;  %316 = vmatprep.subr.bf16.mxu1 %v333_v2  ;;  %v338_v7 = vld [vmem:[%s442_s1 + $0x20] sm:$0xff]   ;;  %v340_v9 = vld [vmem:[%s442_s1 + $0x18] sm:$0xff]   ;;  %v342_v13 = vld [vmem:[%s442_s1 + $0x10] sm:$0xff]  }
   0x5   :  { %v349_v11 = vld [vmem:[%s443_s0 + $0x4] ss:$8 sps:$4 sm:$0xff]   ;;  %v352_v12 = vld [vmem:[%s443_s0 + $0x14] ss:$8 sps:$4 sm:$0xff]   ;;  %v347_v18 = vld [vmem:[%s443_s0] ss:$8 sps:$4 sm:$0xff]  }
   0x6   :  { %v343_v14 = vld [vmem:[%s442_s1 + $0x48] sm:$0xff]   ;;  %206 = vmatprep.mubr.bf16.mxu0 %v349_v11  ;;  %214 = vmatprep.mubr.bf16.mxu1 %v352_v12  ;;  %v345_v16 = vld [vmem:[%s442_s1 + $0x40] sm:$0xff]   ;;  %v350_v19 = vld [vmem:[%s443_s0 + $0x10] ss:$8 sps:$4 sm:$0xff]  }
   0x7   :  { %290 = vmatpush3.bf16.msra.mxu0 %v334_v3  ;;  %324 = vmatpush3.bf16.msra.mxu1 %v334_v3  ;;  %v344_v15 = vld [vmem:[%s442_s1 + $0x8] sm:$0xff]   ;;  %v346_v17 = vld [vmem:[%s442_s1] sm:$0xff]  }
   0x8   :  { %291 = vmatprep.subr.bf16.mxu0 %v335_v4  ;;  %317 = vmatprep.subr.bf16.mxu1 %v335_v4  ;;  %v247_v28 = vld [vmem:[%s444_s2] ss:$0 sm:$0xff] }
   0xb   :  { %292 = vmatpush3.bf16.msra.mxu0 %v336_v5  ;;  %325 = vmatpush3.bf16.msra.mxu1 %v336_v5 }
   0xc   :  { %293 = vmatprep.subr.bf16.mxu0 %v337_v6  ;;  %318 = vmatprep.subr.bf16.mxu1 %v337_v6 }
   0xf   :  { %294 = vmatpush3.bf16.msra.mxu0 %v338_v7  ;;  %326 = vmatpush3.bf16.msra.mxu1 %v338_v7 }
  0x10   :  { %295 = vmatprep.subr.bf16.mxu0 %v339_v8  ;;  %319 = vmatprep.subr.bf16.mxu1 %v339_v8 }
  0x13   :  { %296 = vmatpush3.bf16.msra.mxu0 %v340_v9  ;;  %327 = vmatpush3.bf16.msra.mxu1 %v340_v9 }
  0x14   :  { %297 = vmatprep.subr.bf16.mxu0 %v341_v10  ;;  %320 = vmatprep.subr.bf16.mxu1 %v341_v10 }
  0x17   :  { %298 = vmatpush3.bf16.msra.mxu0 %v342_v13  ;;  %328 = vmatpush3.bf16.msra.mxu1 %v342_v13 }
  0x18   :  { %299 = vmatprep.subr.bf16.mxu0 %v343_v14  ;;  %321 = vmatprep.subr.bf16.mxu1 %v343_v14 }
  0x1b   :  { %300 = vmatpush3.bf16.msra.mxu0 %v344_v15  ;;  %329 = vmatpush3.bf16.msra.mxu1 %v344_v15 }
  0x1c   :  { %301 = vmatprep.subr.bf16.mxu0 %v345_v16  ;;  %322 = vmatprep.subr.bf16.mxu1 %v345_v16 }
  0x1f   :  { %302 = vmatpush3.bf16.msra.mxu0 %v346_v17  ;;  %330 = vmatpush3.bf16.msra.mxu1 %v346_v17 }
  0x22   :  { %207 = vmatmul.mubr.bf16.vlgmr.msra.gmra.mxu0 %v347_v18  ;;  %215 = vmatmul.mubr.bf16.vlgmr.msra.gmra.mxu1 %v350_v19 }
  0xe2   :  { %v303_v20 = vpop.f32.mrf.mxu0  ;;  %v309_v21 = vpop.f32.mrf.mxu1 }
  0xe4   :  { %v304_v22 = vpop.f32.mrf.mxu0  ;;  %v310_v23 = vpop.f32.mrf.mxu1 }
  0xe5   :  { %v305_v26 = vadd.f32 %v304_v22, %v303_v20  ;;  %v311_v27 = vadd.f32 %v310_v23, %v309_v21 }
  0xe6   :  { %v306_v24 = vpop.f32.mrf.mxu0  ;;  %v312_v25 = vpop.f32.mrf.mxu1 }
  0xe7   :  { %v209_v33 = vadd.f32 %v305_v26, %v247_v28  ;;  %v217_v34 = vadd.f32 %v311_v27, %v247_v28 }
  0xe8   :  { %v307_v29 = vpop.f32.mrf.mxu0  ;;  %v313_v30 = vpop.f32.mrf.mxu1 }
  0xe9   :  { %v308_v31 = vadd.f32 %v307_v29, %v306_v24  ;;  %v314_v32 = vadd.f32 %v313_v30, %v312_v25 }
  0xeb   :  { %v212_v35 = vadd.f32 %v308_v31, %v247_v28  ;;  %v220_v36 = vadd.f32 %v314_v32, %v247_v28 }
  0xed   :  { %v279_v37 = vpack.c.bf16 %v212_v35, %v209_v33  ;;  %v284_v38 = vpack.c.bf16 %v220_v36, %v217_v34 }
  0xef   :  { %280 = vst [vmem:[%s445_s3] sm:$0xff] %v279_v37   ;;  %286 = vst [vmem:[%s445_s3 + $0x8] sm:$0xff] %v284_v38  }

</bundles_post_ra>
